<compile_context>
chip_gen: v7x
topology: tpu7x:2x2x1
jax: 0.10.0
libtpu: 0.0.40
codegen_flags: <defaults>
</compile_context>

<pallas_src>
import functools

import jax
import jax.numpy as jnp
import numpy as np
from jax.experimental import pallas as pl
from jax.experimental.pallas import tpu as pltpu


def _warp_kernel(pooled_ref, w_ref, b_ref, out_ref):
    # pooled_ref: (TB, CKKp)  bf16  pooled patch features for this batch tile
    # w_ref:      (CKKp, Kp)  bf16  combined (patch-embed @ fc) weight
    # b_ref:      (1, Kp)     f32   combined bias
    # out_ref:    (TB, Kp)    f32   lane/sublane-dense output slab
    out_ref[...] = jnp.dot(pooled_ref[...], w_ref[...],
                           preferred_element_type=jnp.float32) + b_ref[...]


def _round_up(x, m):
    return (x + m - 1) // m * m


@functools.partial(jax.jit, static_argnames=("patch", "tb"))
def warp_module_forward(x, w_patch, b_patch, w_fc, b_fc, *, patch, tb=128):
    """x: NCHW float32 [B, C, H, W] -> logits [B, K]."""
    B, C, H, W = x.shape
    k = patch
    Ph, Pw = H // k, W // k
    CKK = C * k * k
    D = w_patch.shape[1]
    K = w_fc.shape[1]
    del D  # folded into the combined weight below

    # Batch tile: big enough to fill the MXU M dim at real batch sizes, but
    # never grossly over-padding a tiny batch (multiple of 8 sublanes).
    TB = _round_up(min(tb, _round_up(B, 8)), 8)
    B_pad = pl.cdiv(B, TB) * TB
    CKKp = pl.cdiv(CKK, 128) * 128     # lane-dense contraction width
    Kp = pl.cdiv(K, 128) * 128         # lane-dense output width

    # ---- backbone "model(x)" prep: conv-patchify + global average pool.
    # The mean over patch positions commutes with the linear patch-embedding,
    # so pool the raw input first (in f32, in the wrapper).  This removes the
    # materialized im2col array and the P-x larger kernel input entirely.
    pooled = x.reshape(B, C, Ph, k, Pw, k).mean(axis=(2, 4))   # (B, C, k, k)
    pooled = pooled.reshape(B, CKK)
    pooled = jnp.pad(pooled, ((0, B_pad - B), (0, CKKp - CKK)))
    pooled = pooled.astype(jnp.bfloat16)                        # (B_pad, CKKp)

    # ---- fold patch-embedding and fc head into one linear map (exact here
    # because there is no nonlinearity between them in this synthetic model).
    # TODO(synk): for a nonlinear backbone keep two matmuls + activation.
    w_comb = (w_patch @ w_fc).astype(jnp.float32)               # (CKK, K)
    b_comb = (b_patch @ w_fc + b_fc).astype(jnp.float32)        # (K,)
    w_comb = jnp.pad(w_comb, ((0, CKKp - CKK), (0, Kp - K))).astype(jnp.bfloat16)
    b_comb = jnp.pad(b_comb, (0, Kp - K)).reshape(1, Kp)

    # VMEM budget derived from the actual blocks (double-buffered activation
    # and output, single-buffered weights), with headroom, capped at 64 MiB
    # so the same setting is safe on v7x.
    vmem_need = (2 * TB * CKKp * 2          # pooled tile (bf16, 2 buffers)
                 + CKKp * Kp * 2            # combined weight (bf16, 1 buffer)
                 + 8 * Kp * 4               # bias (f32, sublane-padded)
                 + 2 * TB * Kp * 4)         # output tile (f32, 2 buffers)
    vmem_limit = min(max(2 * vmem_need, 4 * 1024 * 1024), 64 * 1024 * 1024)

    grid_spec = pltpu.PrefetchScalarGridSpec(
        num_scalar_prefetch=0,
        grid=(B_pad // TB,),
        in_specs=[
            pl.BlockSpec((TB, CKKp), lambda b: (b, 0)),          # pooled tile
            pl.BlockSpec((CKKp, Kp), lambda b: (0, 0),
                         pipeline_mode=pl.Buffered(1)),          # W_comb
            pl.BlockSpec((1, Kp), lambda b: (0, 0),
                         pipeline_mode=pl.Buffered(1)),          # b_comb
        ],
        out_specs=pl.BlockSpec((TB, Kp), lambda b: (b, 0)),
    )

    out_padded = pl.pallas_call(
        _warp_kernel,
        out_shape=jax.ShapeDtypeStruct((B_pad, Kp), jnp.float32),
        grid_spec=grid_spec,
        compiler_params=pltpu.CompilerParams(
            dimension_semantics=("parallel",),
            vmem_limit_bytes=int(vmem_limit)),
    )(pooled, w_comb, b_comb)

    return out_padded[:B, :K]


def _reference(x, w_patch, b_patch, w_fc, b_fc, patch):
    # Straight (un-fused, un-pooled-first) f32 reference: conv-patchify,
    # bias, global average pool (== model(x)), then the fc head.
    B, C, H, W = x.shape
    k = patch
    Ph, Pw = H // k, W // k
    patches = x.reshape(B, C, Ph, k, Pw, k)
    patches = patches.transpose(0, 2, 4, 1, 3, 5).reshape(B, Ph * Pw, C * k * k)
    feat = patches @ w_patch + b_patch          # (B, P, D)
    pooled = feat.mean(axis=1)                  # (B, D)  == model(x)
    return pooled @ w_fc + b_fc                 # (B, K)  == model.fc(...)


if __name__ == "__main__":
    # Small shapes: batch=2, channels=4, spatial=16x16, patch=4,
    # feature dim D=32, head output K=8.
    B, C, H, W = 2, 4, 16, 16
    patch = 4
    D, K = 32, 8
    CKK = C * patch * patch

    key = jax.random.PRNGKey(0)
    kx, kw1, kb1, kw2, kb2 = jax.random.split(key, 5)

    x = jax.random.normal(kx, (B, C, H, W), dtype=jnp.float32)
    w_patch = jax.random.normal(kw1, (CKK, D), dtype=jnp.float32) * 0.05
    b_patch = jax.random.normal(kb1, (D,), dtype=jnp.float32) * 0.05
    w_fc = jax.random.normal(kw2, (D, K), dtype=jnp.float32) * 0.05
    b_fc = jax.random.normal(kb2, (K,), dtype=jnp.float32) * 0.05

    out = warp_module_forward(x, w_patch, b_patch, w_fc, b_fc, patch=patch)
    out = jax.block_until_ready(out)

    ref = _reference(np.asarray(x), np.asarray(w_patch), np.asarray(b_patch),
                     np.asarray(w_fc), np.asarray(b_fc), patch)
    # bf16 matmul inputs (f32 accumulation) -> bf16-level tolerance vs the
    # full-f32 reference.
    np.testing.assert_allclose(np.asarray(out), ref, rtol=5e-2, atol=5e-3)

    print("KERNEL_OK")
</pallas_src>

<mosaic_0001>
module attributes {stable_mosaic.version = 11 : i64} {
  func.func @_warp_kernel(%arg0: i32, %arg1: memref<8x128xbf16, #tpu.memory_space<vmem>>, %arg2: memref<128x128xbf16, #tpu.memory_space<vmem>>, %arg3: memref<1x128xf32, #tpu.memory_space<vmem>>, %arg4: memref<8x128xf32, #tpu.memory_space<vmem>>) attributes {dimension_semantics = [#tpu.dimension_semantics<parallel>], iteration_bounds = array<i64: 1>, scalar_prefetch = 0 : i64, scratch_operands = 0 : i64, tpu.core_type = #tpu.core_type<tc>, window_params = [{transform_indices = @transform_0, window_bounds = array<i64: 8, 128>}, {pipeline_mode = #tpu.pipeline_mode<synchronous>, transform_indices = @transform_1, window_bounds = array<i64: 128, 128>}, {pipeline_mode = #tpu.pipeline_mode<synchronous>, transform_indices = @transform_2, window_bounds = array<i64: 1, 128>}, {transform_indices = @transform_3, window_bounds = array<i64: 8, 128>}]} {
    %c0 = arith.constant 0 : index
    %c0_0 = arith.constant 0 : index
    %0 = vector.load %arg1[%c0, %c0_0] : memref<8x128xbf16, #tpu.memory_space<vmem>>, vector<8x128xbf16>
    %c0_1 = arith.constant 0 : index
    %c0_2 = arith.constant 0 : index
    %1 = vector.load %arg2[%c0_1, %c0_2] : memref<128x128xbf16, #tpu.memory_space<vmem>>, vector<128x128xbf16>
    %cst = arith.constant dense<0.000000e+00> : vector<8x128xf32>
    %2 = tpu.matmul %0, %1, %cst {dimension_numbers = #tpu.dot_dimension_numbers<[1], [0], [0], [1], [0, 0, 1, 1], [], []>} : vector<8x128xbf16>, vector<128x128xbf16>, vector<8x128xf32> -> vector<8x128xf32>
    %c0_3 = arith.constant 0 : index
    %c0_4 = arith.constant 0 : index
    %3 = vector.load %arg3[%c0_3, %c0_4] : memref<1x128xf32, #tpu.memory_space<vmem>>, vector<1x128xf32>
    %4 = vector.broadcast %3 : vector<1x128xf32> to vector<8x128xf32>
    %5 = arith.addf %2, %4 : vector<8x128xf32>
    %c0_5 = arith.constant 0 : index
    %c0_6 = arith.constant 0 : index
    %6 = vector.load %arg4[%c0_5, %c0_6] : memref<8x128xf32, #tpu.memory_space<vmem>>, vector<8x128xf32>
    tpu.vector_store %arg4[%c0_5, %c0_6], %5 {strides = array<i32>} : memref<8x128xf32, #tpu.memory_space<vmem>>, vector<8x128xf32>,
    return
  }
  func.func @transform_0(%arg0: i32) -> (i32, i32) {
    %c0_i32 = arith.constant 0 : i32
    %c0_i32_0 = arith.constant 0 : i32
    return %arg0, %c0_i32 : i32, i32
  }
  func.func @transform_1(%arg0: i32) -> (i32, i32) {
    %c0_i32 = arith.constant 0 : i32
    %c0_i32_0 = arith.constant 0 : i32
    %c0_i32_1 = arith.constant 0 : i32
    return %c0_i32, %c0_i32_0 : i32, i32
  }
  func.func @transform_2(%arg0: i32) -> (i32, i32) {
    %c0_i32 = arith.constant 0 : i32
    %c0_i32_0 = arith.constant 0 : i32
    %c0_i32_1 = arith.constant 0 : i32
    return %c0_i32, %c0_i32_0 : i32, i32
  }
  func.func @transform_3(%arg0: i32) -> (i32, i32) {
    %c0_i32 = arith.constant 0 : i32
    %c0_i32_0 = arith.constant 0 : i32
    return %arg0, %c0_i32 : i32, i32
  }
}

</mosaic_0001>

<bundles_post_ra>
// kernel: warp_module_forward.1
= control target key start
LH: loop header
LB: loop body
LE: loop exit
PB: predicated region body
PF: predicated region fallthrough
CT: control target
= control target key end

     0   :  { %v180_v0 = vmov 0.0   ;;  %vm181_vm0 = vmmov 0   ;;  %s235_s1 = inlined_call_operand.vmem [shape: bf16[128,128], index: 1, kind: input, shape index: {}]   ;;  %s236_s0 = inlined_call_operand.vmem [shape: bf16[8,128], index: 0, kind: input, shape index: {}]   ;;  %s237_s2 = inlined_call_operand.vmem [shape: f32[1,128], index: 2, kind: input, shape index: {}]   ;;  %s238_s3 = inlined_call_operand.vmem [shape: f32[8,128], index: 3, kind: output, shape index: {}]  }
   0x1   :  { %150 = vmatprep.subr.bf16.mxu0 %v180_v0  ;;  %v172_v1 = vld [vmem:[%s235_s1] sm:$0xff]   ;;  %166 = vmatprep.mubr.msk.bf16.mxu0 %vm181_vm0, %v180_v0  ;;  %v173_v2 = vld [vmem:[%s235_s1 + $0x8] sm:$0xff]   ;;  %v174_v3 = vld [vmem:[%s235_s1 + $0x10] sm:$0xff]  }
   0x2   :  { %151 = vmatpush3.bf16.msra.mxu0 %v172_v1  ;;  %v175_v4 = vld [vmem:[%s235_s1 + $0x18] sm:$0xff]   ;;  %v176_v5 = vld [vmem:[%s235_s1 + $0x20] sm:$0xff]   ;;  %v177_v6 = vld [vmem:[%s235_s1 + $0x28] sm:$0xff]  }
   0x3   :  { %152 = vmatprep.subr.bf16.mxu0 %v180_v0  ;;  %v178_v7 = vld [vmem:[%s235_s1 + $0x30] sm:$0xff]   ;;  %v179_v8 = vld [vmem:[%s235_s1 + $0x38] sm:$0xff]   ;;  %v15_v9 = vld [vmem:[%s236_s0] sm:$0xf] }
   0x4   :  { %v132_v10 = vld [vmem:[%s237_s2] ss:$0 sm:$0xff] }
   0x6   :  { %153 = vmatpush3.bf16.msra.mxu0 %v173_v2 }
   0x7   :  { %154 = vmatprep.subr.bf16.mxu0 %v180_v0 }
   0xa   :  { %155 = vmatpush3.bf16.msra.mxu0 %v174_v3 }
   0xb   :  { %156 = vmatprep.subr.bf16.mxu0 %v180_v0 }
   0xe   :  { %157 = vmatpush3.bf16.msra.mxu0 %v175_v4 }
   0xf   :  { %158 = vmatprep.subr.bf16.mxu0 %v180_v0 }
  0x12   :  { %159 = vmatpush3.bf16.msra.mxu0 %v176_v5 }
  0x13   :  { %160 = vmatprep.subr.bf16.mxu0 %v180_v0 }
  0x16   :  { %161 = vmatpush3.bf16.msra.mxu0 %v177_v6 }
  0x17   :  { %162 = vmatprep.subr.bf16.mxu0 %v180_v0 }
  0x1a   :  { %163 = vmatpush3.bf16.msra.mxu0 %v178_v7 }
  0x1b   :  { %164 = vmatprep.subr.bf16.mxu0 %v180_v0 }
  0x1e   :  { %165 = vmatpush3.bf16.msra.mxu0 %v179_v8 }
  0x21   :  { %167 = vmatmul.mubr.bf16.vlgmr.msra.gmra.mrb[0].mxu0 %v15_v9 }
  0xf4   :  { %v121_v11 = vpop.f32.mrb[0].mxu0 }
  0xf5   :  { %v122_v12 = vadd.f32 %v132_v10, %v121_v11  ;;  %v168_v13 = vpop.f32.mrb[1].mxu0 }
  0xf6   :  { %v124_v14 = vpop.f32.mrb[2].mxu0 }
  0xf7   :  { %127 = vst [vmem:[%s238_s3] sm:$0xff] %v122_v12  ;;  %v169_v15 = vpop.f32.mrb[3].mxu0 }

</bundles_post_ra>
